<compile_context>
chip_gen: v5e
topology: v5e:2x2
jax: 0.10.0
libtpu: 0.0.40
codegen_flags: <defaults>
</compile_context>

<pallas_src>
import numpy as np
import jax
import jax.numpy as jnp
from jax.experimental import pallas as pl
from jax.experimental.pallas import tpu as pltpu


def _cbc_loss_kernel(p_ref, y_ref, out_ref):
    """Accumulates per-batch vector partials (sum_y, s1, s2) into out_ref.

    p_ref / y_ref blocks: (1, TILE_S, 128)
    out_ref block:        (1, 3, 8, 128)  -- [sum_y, s1, s2] as (8,128) slabs
    """
    s = pl.program_id(1)

    @pl.when(s == 0)
    def _():
        out_ref[...] = jnp.zeros_like(out_ref)

    eps = jnp.float32(1e-20)
    p = p_ref[0].astype(jnp.float32)  # (TILE_S, 128)
    y = y_ref[0].astype(jnp.float32)

    one_minus_y = 1.0 - y
    t1 = y * jnp.log(p + eps)
    t2 = one_minus_y * jnp.log(1.0 - p + eps)

    tile_s = p.shape[0]

    def fold(x):
        # (TILE_S, 128) -> (8, 128) partial sums.  This is just elementwise
        # adds of TILE_S//8 vregs (VPU only, no cross-lane XLU reduce).
        return jnp.sum(x.reshape(tile_s // 8, 8, 128), axis=0)

    out_ref[0, 0] += fold(y)    # sum(y)
    out_ref[0, 1] += fold(t1)   # sum(y * log(p + eps))
    out_ref[0, 2] += fold(t2)   # sum((1-y) * log(1 - p + eps))


def cbc_loss(p, y, *, tile_s_max=2048):
    """Pallas implementation of CBCLoss.forward(p, y) for NCHW inputs."""
    assert p.shape == y.shape
    N = p.shape[0]
    flat = int(np.prod(p.shape[1:]))  # real element count per batch item

    # Reshape per-batch slab to (S, 128); pad S up to a multiple of the tile
    # height (and 8).  Padding with zeros is exact for this loss (see header).
    S = pl.cdiv(flat, 128)
    tile_s = min(int(tile_s_max), ((S + 7) // 8) * 8)
    num_s_tiles = pl.cdiv(S, tile_s)
    S_padded = num_s_tiles * tile_s
    pad = S_padded * 128 - flat

    def prep(x):
        x = x.reshape(N, flat)
        if pad:
            x = jnp.pad(x, ((0, 0), (0, pad)))
        return x.reshape(N, S_padded, 128)

    p3 = prep(p)
    y3 = prep(y)

    stats = pl.pallas_call(
        _cbc_loss_kernel,
        out_shape=jax.ShapeDtypeStruct((N, 3, 8, 128), jnp.float32),
        grid_spec=pltpu.PrefetchScalarGridSpec(
            num_scalar_prefetch=0,
            grid=(N, num_s_tiles),
            in_specs=[
                pl.BlockSpec((1, tile_s, 128), lambda b, s: (b, s, 0)),
                pl.BlockSpec((1, tile_s, 128), lambda b, s: (b, s, 0)),
            ],
            # Output block depends only on b -> resident accumulator across s.
            out_specs=pl.BlockSpec((1, 3, 8, 128), lambda b, s: (b, 0, 0, 0)),
        ),
        compiler_params=pltpu.CompilerParams(
            dimension_semantics=("parallel", "arbitrary"),
            vmem_limit_bytes=32 * 1024 * 1024,
        ),
    )(p3, y3)

    # Tiny cross-lane finalization in plain JAX (once, not per grid step).
    sum_y = jnp.sum(stats[:, 0], axis=(1, 2))  # (N,)
    s1 = jnp.sum(stats[:, 1], axis=(1, 2))
    s2 = jnp.sum(stats[:, 2], axis=(1, 2))

    total = jnp.float32(flat)                  # real (unpadded) numel per item
    beta = 1.0 - sum_y / total                 # == sum(1 - y) / numel
    return -jnp.sum(beta * s1 + (1.0 - beta) * s2) / jnp.float32(N)


def cbc_loss_ref(p, y):
    """Pure-JAX reference mirroring the PyTorch forward exactly."""
    eps = 1e-20
    beta = jnp.sum(1.0 - y, axis=(1, 2, 3)) / jnp.sum(
        jnp.ones_like(y), axis=(1, 2, 3)
    )
    s1 = jnp.sum(y * jnp.log(p + eps), axis=(1, 2, 3))
    s2 = jnp.sum((1.0 - y) * jnp.log(1.0 - p + eps), axis=(1, 2, 3))
    return -jnp.sum(beta * s1 + (1.0 - beta) * s2) / s1.shape[0]


if __name__ == "__main__":
    key = jax.random.PRNGKey(0)
    kp, ky = jax.random.split(key)

    N, C, H, W = 2, 4, 16, 16  # NCHW, C*H*W = 1024
    # p: predicted probabilities in (0, 1); y: binary ground-truth edges.
    p = jax.nn.sigmoid(jax.random.normal(kp, (N, C, H, W), dtype=jnp.float32))
    y = (jax.random.uniform(ky, (N, C, H, W)) < 0.3).astype(jnp.float32)

    loss = jax.block_until_ready(cbc_loss(p, y))
    ref = jax.block_until_ready(cbc_loss_ref(p, y))

    assert np.allclose(np.asarray(loss), np.asarray(ref), rtol=1e-5, atol=1e-5), (
        loss,
        ref,
    )
    print("KERNEL_OK")
</pallas_src>

<mosaic_0001>
module attributes {stable_mosaic.version = 11 : i64} {
  func.func @_cbc_loss_kernel(%arg0: i32, %arg1: i32, %arg2: memref<1x8x128xf32, #tpu.memory_space<vmem>>, %arg3: memref<1x8x128xf32, #tpu.memory_space<vmem>>, %arg4: memref<1x3x8x128xf32, #tpu.memory_space<vmem>>) attributes {dimension_semantics = [#tpu.dimension_semantics<parallel>, #tpu.dimension_semantics<arbitrary>], iteration_bounds = array<i64: 2, 1>, scalar_prefetch = 0 : i64, scratch_operands = 0 : i64, tpu.core_type = #tpu.core_type<tc>, window_params = [{transform_indices = @transform_0, window_bounds = array<i64: 1, 8, 128>}, {transform_indices = @transform_1, window_bounds = array<i64: 1, 8, 128>}, {transform_indices = @transform_2, window_bounds = array<i64: 1, 3, 8, 128>}]} {
    %c0_i32 = arith.constant 0 : i32
    %0 = arith.cmpi eq, %arg1, %c0_i32 : i32
    %1 = arith.extui %0 : i1 to i32
    %c0_i32_0 = arith.constant 0 : i32
    %2 = arith.cmpi ne, %1, %c0_i32_0 : i32
    scf.if %2 {
      %cst_34 = arith.constant 0.000000e+00 : f32
      %43 = vector.broadcast %cst_34 : f32 to vector<1x3x8x128xf32>
      %c0_35 = arith.constant 0 : index
      %c0_36 = arith.constant 0 : index
      %c0_37 = arith.constant 0 : index
      %c0_38 = arith.constant 0 : index
      %44 = vector.load %arg4[%c0_35, %c0_36, %c0_37, %c0_38] : memref<1x3x8x128xf32, #tpu.memory_space<vmem>>, vector<1x3x8x128xf32>
      tpu.vector_store %arg4[%c0_35, %c0_36, %c0_37, %c0_38], %43 {strides = array<i32>} : memref<1x3x8x128xf32, #tpu.memory_space<vmem>>, vector<1x3x8x128xf32>,
    } else {
    }
    %c0 = arith.constant 0 : index
    %c0_1 = arith.constant 0 : index
    %c0_2 = arith.constant 0 : index
    %3 = vector.load %arg2[%c0, %c0_1, %c0_2] : memref<1x8x128xf32, #tpu.memory_space<vmem>>, vector<1x8x128xf32>
    %4 = vector.shape_cast %3 : vector<1x8x128xf32> to vector<8x128xf32>
    %c0_3 = arith.constant 0 : index
    %c0_4 = arith.constant 0 : index
    %c0_5 = arith.constant 0 : index
    %5 = vector.load %arg3[%c0_3, %c0_4, %c0_5] : memref<1x8x128xf32, #tpu.memory_space<vmem>>, vector<1x8x128xf32>
    %6 = vector.shape_cast %5 : vector<1x8x128xf32> to vector<8x128xf32>
    %cst = arith.constant 1.000000e+00 : f32
    %7 = vector.broadcast %cst : f32 to vector<8x128xf32>
    %8 = arith.subf %7, %6 : vector<8x128xf32>
    %cst_6 = arith.constant 9.99999968E-21 : f32
    %9 = vector.broadcast %cst_6 : f32 to vector<8x128xf32>
    %10 = arith.addf %4, %9 : vector<8x128xf32>
    %11 = math.log %10 : vector<8x128xf32>
    %12 = arith.mulf %6, %11 : vector<8x128xf32>
    %cst_7 = arith.constant 1.000000e+00 : f32
    %13 = vector.broadcast %cst_7 : f32 to vector<8x128xf32>
    %14 = arith.subf %13, %4 : vector<8x128xf32>
    %cst_8 = arith.constant 9.99999968E-21 : f32
    %15 = vector.broadcast %cst_8 : f32 to vector<8x128xf32>
    %16 = arith.addf %14, %15 : vector<8x128xf32>
    %17 = math.log %16 : vector<8x128xf32>
    %18 = arith.mulf %8, %17 : vector<8x128xf32>
    %c0_9 = arith.constant 0 : index
    %c0_10 = arith.constant 0 : index
    %c0_11 = arith.constant 0 : index
    %c0_12 = arith.constant 0 : index
    %19 = vector.load %arg4[%c0_9, %c0_10, %c0_11, %c0_12] : memref<1x3x8x128xf32, #tpu.memory_space<vmem>>, vector<1x1x8x128xf32>
    %20 = vector.shape_cast %19 : vector<1x1x8x128xf32> to vector<8x128xf32>
    %21 = vector.shape_cast %6 : vector<8x128xf32> to vector<1x8x128xf32>
    %cst_13 = arith.constant dense<0.000000e+00> : vector<8x128xf32>
    %22 = vector.multi_reduction <add>, %21, %cst_13 [0] : vector<1x8x128xf32> to vector<8x128xf32>
    %23 = arith.addf %20, %22 : vector<8x128xf32>
    %c0_14 = arith.constant 0 : index
    %c0_15 = arith.constant 0 : index
    %c0_16 = arith.constant 0 : index
    %c0_17 = arith.constant 0 : index
    %24 = vector.load %arg4[%c0_14, %c0_15, %c0_16, %c0_17] : memref<1x3x8x128xf32, #tpu.memory_space<vmem>>, vector<1x1x8x128xf32>
    %25 = vector.shape_cast %24 : vector<1x1x8x128xf32> to vector<8x128xf32>
    %26 = vector.shape_cast %23 : vector<8x128xf32> to vector<1x1x8x128xf32>
    tpu.vector_store %arg4[%c0_14, %c0_15, %c0_16, %c0_17], %26 {strides = array<i32>} : memref<1x3x8x128xf32, #tpu.memory_space<vmem>>, vector<1x1x8x128xf32>,
    %c0_18 = arith.constant 0 : index
    %c1 = arith.constant 1 : index
    %c0_19 = arith.constant 0 : index
    %c0_20 = arith.constant 0 : index
    %27 = vector.load %arg4[%c0_18, %c1, %c0_19, %c0_20] : memref<1x3x8x128xf32, #tpu.memory_space<vmem>>, vector<1x1x8x128xf32>
    %28 = vector.shape_cast %27 : vector<1x1x8x128xf32> to vector<8x128xf32>
    %29 = vector.shape_cast %12 : vector<8x128xf32> to vector<1x8x128xf32>
    %cst_21 = arith.constant dense<0.000000e+00> : vector<8x128xf32>
    %30 = vector.multi_reduction <add>, %29, %cst_21 [0] : vector<1x8x128xf32> to vector<8x128xf32>
    %31 = arith.addf %28, %30 : vector<8x128xf32>
    %c0_22 = arith.constant 0 : index
    %c1_23 = arith.constant 1 : index
    %c0_24 = arith.constant 0 : index
    %c0_25 = arith.constant 0 : index
    %32 = vector.load %arg4[%c0_22, %c1_23, %c0_24, %c0_25] : memref<1x3x8x128xf32, #tpu.memory_space<vmem>>, vector<1x1x8x128xf32>
    %33 = vector.shape_cast %32 : vector<1x1x8x128xf32> to vector<8x128xf32>
    %34 = vector.shape_cast %31 : vector<8x128xf32> to vector<1x1x8x128xf32>
    tpu.vector_store %arg4[%c0_22, %c1_23, %c0_24, %c0_25], %34 {strides = array<i32>} : memref<1x3x8x128xf32, #tpu.memory_space<vmem>>, vector<1x1x8x128xf32>,
    %c0_26 = arith.constant 0 : index
    %c2 = arith.constant 2 : index
    %c0_27 = arith.constant 0 : index
    %c0_28 = arith.constant 0 : index
    %35 = vector.load %arg4[%c0_26, %c2, %c0_27, %c0_28] : memref<1x3x8x128xf32, #tpu.memory_space<vmem>>, vector<1x1x8x128xf32>
    %36 = vector.shape_cast %35 : vector<1x1x8x128xf32> to vector<8x128xf32>
    %37 = vector.shape_cast %18 : vector<8x128xf32> to vector<1x8x128xf32>
    %cst_29 = arith.constant dense<0.000000e+00> : vector<8x128xf32>
    %38 = vector.multi_reduction <add>, %37, %cst_29 [0] : vector<1x8x128xf32> to vector<8x128xf32>
    %39 = arith.addf %36, %38 : vector<8x128xf32>
    %c0_30 = arith.constant 0 : index
    %c2_31 = arith.constant 2 : index
    %c0_32 = arith.constant 0 : index
    %c0_33 = arith.constant 0 : index
    %40 = vector.load %arg4[%c0_30, %c2_31, %c0_32, %c0_33] : memref<1x3x8x128xf32, #tpu.memory_space<vmem>>, vector<1x1x8x128xf32>
    %41 = vector.shape_cast %40 : vector<1x1x8x128xf32> to vector<8x128xf32>
    %42 = vector.shape_cast %39 : vector<8x128xf32> to vector<1x1x8x128xf32>
    tpu.vector_store %arg4[%c0_30, %c2_31, %c0_32, %c0_33], %42 {strides = array<i32>} : memref<1x3x8x128xf32, #tpu.memory_space<vmem>>, vector<1x1x8x128xf32>,
    return
  }
  func.func @transform_0(%arg0: i32, %arg1: i32) -> (i32, i32, i32) {
    %c0_i32 = arith.constant 0 : i32
    %c0_i32_0 = arith.constant 0 : i32
    return %arg0, %arg1, %c0_i32 : i32, i32, i32
  }
  func.func @transform_1(%arg0: i32, %arg1: i32) -> (i32, i32, i32) {
    %c0_i32 = arith.constant 0 : i32
    %c0_i32_0 = arith.constant 0 : i32
    return %arg0, %arg1, %c0_i32 : i32, i32, i32
  }
  func.func @transform_2(%arg0: i32, %arg1: i32) -> (i32, i32, i32, i32) {
    %c0_i32 = arith.constant 0 : i32
    %c0_i32_0 = arith.constant 0 : i32
    %c0_i32_1 = arith.constant 0 : i32
    %c0_i32_2 = arith.constant 0 : i32
    return %arg0, %c0_i32, %c0_i32_0, %c0_i32_1 : i32, i32, i32, i32
  }
}

</mosaic_0001>

<bundles_post_ra>
// kernel: tpu_custom_call.1
= control target key start
LH: loop header
LB: loop body
LE: loop exit
PB: predicated region body
PF: predicated region fallthrough
CT: control target
= control target key end

     0   :  { %7 = vsyncpa [#allocation3], 0  ;;  %s761_s0 = inlined_call_operand.hbm [shape: f32[2,8,128], index: 0, kind: input, shape index: {}]   ;;  %s762_s1 = inlined_call_operand.hbm [shape: f32[2,8,128], index: 1, kind: input, shape index: {}]   ;;  %s763_s2 = inlined_call_operand.hbm [shape: f32[2,3,8,128], index: 2, kind: output, shape index: {}]  }
   0x1   :  { %9 = vsyncpa [#allocation3 + $0x1], 0 }
   0x2   :  { %10 = vsyncpa [#allocation6], 0 }
   0x3   :  { %12 = vsyncpa [#allocation6 + $0x1], 0 }
   0x4   :  { %13 = vsyncpa [#allocation4], 0 }
   0x5   :  { %15 = vsyncpa [#allocation4 + $0x1], 0  ;;  %s632_s9 = smov 0   ;;  %s634_s10 = smov 0  }
   0x6   :  { %s636_s11 = smov 0   ;;  %s638_s12 = smov 0  }
   0x7   :  { %s640_s13 = smov 0   ;;  %s642_s14 = smov 0  }
   0x8 LB: > { %s373_s15 = sadd.s32 4294967295, %s613_s14   ;;  %s374_s16 = sadd.s32 4294967294, %s613_s14   ;;  %s613_s14 = sphi %s642_s14, %s21_s14   ;;  %s609_s13 = sphi %s640_s13, %s772_s13   ;;  %s605_s12 = sphi %s638_s12, %s771_s12   ;;  %s601_s11 = sphi %s636_s11, %s770_s11   ;;  %s597_s10 = sphi %s634_s10, %s769_s10   ;;  %s593_s9 = sphi %s632_s9, %s768_s9  }
   0x9   : > { %s33_s17 = sadd.s32 1, %s609_s13  ;;  %s42_s18 = sadd.s32 1, %s601_s11 }
   0xa   : > { %p35_p0 = scmp.ge.s32.totalorder %s33_s17, 2  ;;  %p49_p1 = scmp.ne.s32.totalorder %s601_s11, %s597_s10 }
   0xb   : > { %p50_p2 = scmp.eq.s32.totalorder %s613_s14, 0  ;;  %p55_p3 = scmp.ne.s32.totalorder %s597_s10, %s593_s9 }
   0xc   : > { %s774_s17 = smov (%p35_p0, %s33_s17), 0  ;;  %p56_p5 = scmp.eq.s32.totalorder %s373_s15, 0 }
   0xd   : > { %p673_p4 = por %p50_p2, %p49_p1  ;;  %s37_s20 = ssub.s32 %s609_s13, %s774_s17 }
   0xe   : > { %p107_p6 = scmp.eq.s32.totalorder %s373_s15, 1  ;;  %p40_p7 = scmp.eq.s32.totalorder %s37_s20, 0 }
   0xf   : > { %p679_p8 = por %p56_p5, %p55_p3  ;;  %p113_p10 = scmp.eq.s32.totalorder %s374_s16, 1 }
  0x10   : > { %p683_p9 = por %p107_p6, %p49_p1  ;;  %p376_p12 = scmp.ge.s32.totalorder %s613_s14, 2 }
  0x11   : > { %s688_s23 = scalar_select %p40_p7, %s601_s11, %s42_s18  }
  0x12   : > { %p690_p11 = por %p113_p10, %p55_p3  ;;  %p410_p13 = scmp.lt.s32.totalorder %s613_s14, 2 }
  0x13   : > { %s133_s25 = sand.u32 1, %s601_s11   ;;  %s378_s27 = sshll.u32 %s609_s13, 3 }
  0x14   : > { %s377_s26 = sshll.u32 %s133_s25, 3  ;;  %s142_s30 = scalar_lea.hbm %s761_s0, %s378_s27 }
  0x15   : > { %s137_s3 = scalar_lea.vmem [#allocation2], %s377_s26  ;;  %s144_s5 = sshll.u32 %s142_s30, 4  ;;  %s145_s5 = int_to_ptr.hbm [resolvable:$true] %s144_s5 }
  0x16   : > { %s146_s4 = sshll.u32 %s137_s3, 4  ;;  %p400_p0 = pnand %p410_p13, %p673_p4  ;;  %s147_s4 = int_to_ptr.vmem [resolvable:$true] %s146_s4 }
  0x17   : > { %p381_p1 = scmp.ge.s32.totalorder %s613_s14, 1  ;;  %p171_p2 = scmp.lt.s32.totalorder %s613_s14, 3 }
  0x18   : > { %s134_s6 = scalar_lea.sflag [#allocation3], %s133_s25  ;;  %s162_s15 = scalar_lea.hbm %s762_s1, %s378_s27 }
  0x19   : > { %402 = dma.hbm_to_vmem [thread:$0]  (!%p400_p0), %s145_s5, 128, %s147_s4, %s134_s6  }
  0x1a   : > { %p172_p3 = pnand %p381_p1, %p171_p2  ;;  %s157_s16 = scalar_lea.vmem [#allocation5], %s377_s26 }
  0x1b   : > { %s166_s18 = sshll.u32 %s157_s16, 4  ;;  %s164_s20 = sshll.u32 %s162_s15, 4  ;;  %s167_s18 = int_to_ptr.vmem [resolvable:$true] %s166_s18  ;;  %s165_s20 = int_to_ptr.hbm [resolvable:$true] %s164_s20 }
  0x1c   : > { %s154_s28 = scalar_lea.sflag [#allocation6], %s133_s25  ;;  %175 = sbr.rel (%p172_p3) target bundleno = 56 (0x38), region = 28 }
  0x1d   : > { %405 = dma.hbm_to_vmem [thread:$0]  (!%p400_p0), %s165_s20, 128, %s167_s18, %s154_s28  }
  0x1e   : > { %s709_s19 = sand.u32 (!%p172_p3), 1, %s597_s10  }
  0x1f   : > { %s382_s29 = sshll.u32 (!%p172_p3), %s709_s19, 3  ;;  %s178_s30 = scalar_lea.sflag (!%p172_p3), [#allocation3], %s709_s19 }
  0x20   : > { %s181_s3 = scalar_lea.vmem (!%p172_p3), [#allocation2], %s382_s29 }
  0x21   : > { %580 = dma.done.wait (%p679_p8), %s178_s30, 128  }
  0x22   : > { %582 = vsyncadd (%p679_p8), %s178_s30, 4294967168  ;;  %s188_s26 = scalar_lea.sflag [#allocation6], %s709_s19  ;;  %s191_s25 = scalar_lea.vmem [#allocation5], %s382_s29 }
  0x23   : > { %584 = dma.done.wait (%p679_p8), %s188_s26, 128  }
  0x24   : > { %586 = vsyncadd (%p679_p8), %s188_s26, 4294967168  ;;  %s391_s27 = smul.u32 24, %s709_s19  ;;  %v226_v0 = vld [vmem:[%s191_s25] sm:$0xff]  ;;  %v225_v1 = vld [vmem:[%s181_s3] sm:$0xff]  ;;  %s252_s16 = scalar_lea.sflag [#allocation4], %s709_s19 }
  0x25   : > { %v228_v2 = vadd.f32 1e-20, %v225_v1  ;;  %v232_v3 = vsub.f32 1.0, %v225_v1  ;;  %s392_s5 = smul.u32 24, %s605_s12  ;;  %v227_v7 = vsub.f32 1.0, %v226_v0  ;;  %s547_s29 = scalar_lea.hbm %s763_s2, 48 }
  0x26   : > { %s217_s4 = scalar_lea.vmem [#allocation7], %s391_s27 }
  0x27   : > { %240 = vst [vmem:[%s217_s4] sm:$0xff] %v226_v0  ;;  %463 = vlog2.f32 %v228_v2  ;;  %v233_v4 = vadd.f32 1e-20, %v232_v3  ;;  %s263_s7 = scalar_lea.hbm %s763_s2, %s392_s5  ;;  %s264_s8 = sshll.u32 %s217_s4, 4  ;;  %s265_s8 = int_to_ptr.vmem [resolvable:$true] %s264_s8 }
  0x28   : > { %s266_s15 = sshll.u32 %s263_s7, 4  ;;  %s267_s15 = int_to_ptr.hbm [resolvable:$true] %s266_s15 }
  0x29   : > { %465 = vlog2.f32 %v233_v4  ;;  %s541_s12 = sshra.s32 %s267_s15, 4  ;;  %s542_s12 = int_to_ptr.hbm [resolvable:$true] %s541_s12 }
  0x2a   : > { %s543_s18 = scalar_lea.hbm %s542_s12, 24  ;;  %p548_p7 = scmp.lt.s32.totalorder %s542_s12, %s763_s2 }
  0x2b   : > { %p544_p4 = scmp.ne.s32.totalorder %s542_s12, %s543_s18  ;;  %p549_p8 = scmp.lt.s32.totalorder %s547_s29, %s543_s18 }
  0x2d   : > { %v464_v5 = vpop.eup %463  ;;  %p545_p5 = pnand %p544_p4, %p683_p9  ;;  %p550_p10 = por %p549_p8, %p548_p7 }
  0x2e   : > { %v230_v6 = vmul.f32 0.6931472, %v464_v5 }
  0x2f   : > { %v466_v8 = vpop.eup %465  ;;  %p546_p6 = pneg %p545_p5 }
  0x30   : > { %v231_v9 = vmul.f32 %v230_v6, %v226_v0  ;;  %v235_v10 = vmul.f32 0.6931472, %v466_v8 }
  0x31   : > { %p551_p13 = pnand %p550_p10, %p546_p6 }
  0x32   : > { %v236_v11 = vmul.f32 %v235_v10, %v227_v7  ;;  %385 = vst [vmem:[%s217_s4 + $0x8] sm:$0xff] %v231_v9 }
  0x34   : > { %387 = vst [vmem:[%s217_s4 + $0x10] sm:$0xff] %v236_v11 }
  0x35   : > { %554 = shalt.err (!%p551_p13)
}
  0x36   : > { %s615_s19 = smov 128   ;;  %s616_s26 = smov 8  }
  0x37   : > { %397 = dma.vmem_to_hbm [thread:$0]  (%p683_p9), %s265_s8, 384, %s267_s15, %s252_s16, %s615_s19, %s615_s19, %s616_s26  }
  0x38 PF: > { %s281_s25 = sand.u32 1, %s593_s9   ;;  %p407_p0 = pnand %p376_p12, %p690_p11 }
  0x39   : > { %s282_s27 = scalar_lea.sflag [#allocation4], %s281_s25 }
  0x3a   : > { %p408_p1 = pneg %p407_p0 }
  0x3c   : > { %588 = dma.done.wait (%p408_p1), %s282_s27, 384  }
  0x3d   : > { %590 = vsyncadd (%p408_p1), %s282_s27, 4294966912  ;;  %s21_s14 = sadd.s32 1, %s613_s14   ;;  %s768_s9 = smov %s597_s10 }
  0x3e   : > { %p18_p2 = scmp.ge.s32.totalorder %s21_s14, 4   ;;  %s769_s10 = smov %s601_s11 }
  0x3f   : > { %s770_s11 = smov %s688_s23  ;;  %s771_s12 = smov %s609_s13 }
  0x40   : > { %s772_s13 = smov %s774_s17  ;;  %20 = sbr.rel (!%p18_p2) target bundleno = 8 (0x8), region = 92 }
  0x45   :  { %288 = vsyncpa [#allocation3], 1 }
  0x46   :  { %290 = vsyncpa [#allocation3 + $0x1], 1 }
  0x47   :  { %291 = vsyncpa [#allocation6], 1 }
  0x48   :  { %293 = vsyncpa [#allocation6 + $0x1], 1 }
  0x49   :  { %294 = vsyncpa [#allocation4], 1 }
  0x4a   :  { %296 = vsyncpa [#allocation4 + $0x1], 1 }

</bundles_post_ra>
